<compile_context>
chip_gen: v6e
topology: v6e:2x2x1
jax: 0.10.0
libtpu: 0.0.40
codegen_flags: <defaults>
</compile_context>

<pallas_src>
import functools
import math

import jax
import jax.numpy as jnp
from jax import lax
from jax.experimental import pallas as pl
from jax.experimental.pallas import tpu as pltpu


def _clstm_recurrence_kernel(xp_ref, w_hh_ref, out_h_ref, h_sc, c_sc,
                             *, t_chunk, hidden_pad):
    """One grid step: `t_chunk` timesteps of the LSTM recurrence for one
    batch block.

    xp_ref    : (b_block, t_chunk*4H) f32   precomputed x@W_ih + b, lane-dense
    w_hh_ref  : (H, 4H)               bf16  recurrent weights (gate order ifgo)
    out_h_ref : (b_block, t_chunk*H)  f32   hidden-state history, lane-dense
    h_sc,c_sc : (b_block, H)          f32   carries, persist across grid steps
    """
    H = hidden_pad
    G = 4 * H

    # New batch block starts at chunk 0 -> reset the carries.
    @pl.when(pl.program_id(1) == 0)
    def _init():
        h_sc[...] = jnp.zeros_like(h_sc)
        c_sc[...] = jnp.zeros_like(c_sc)

    w_hh = w_hh_ref[...]                        # (H, 4H) bf16, grid-invariant
    h = h_sc[...]                               # (b_block, H) f32
    c = c_sc[...]
    fuse_eup = (G <= 128)                       # full-vreg activation passes

    # Static unrolled loop; per-iteration live state is only a few vregs since
    # the gate slab is loaded from the Ref each step and h is stored each step.
    for t in range(t_chunk):
        gates = (xp_ref[:, t * G:(t + 1) * G]
                 + jnp.dot(h.astype(w_hh.dtype), w_hh,
                           preferred_element_type=jnp.float32))  # (b_block,4H)
        if fuse_eup:
            # 2 full-tile EUP passes instead of 4 quarter-lane ones.
            sig = jax.nn.sigmoid(gates)
            tnh = jnp.tanh(gates)
            i_g = sig[:, 0 * H:1 * H]
            f_g = sig[:, 1 * H:2 * H]
            g_g = tnh[:, 2 * H:3 * H]
            o_g = sig[:, 3 * H:4 * H]
        else:
            i_g = jax.nn.sigmoid(gates[:, 0 * H:1 * H])
            f_g = jax.nn.sigmoid(gates[:, 1 * H:2 * H])
            g_g = jnp.tanh(gates[:, 2 * H:3 * H])
            o_g = jax.nn.sigmoid(gates[:, 3 * H:4 * H])
        c = f_g * c + i_g * g_g
        h = o_g * jnp.tanh(c)
        out_h_ref[:, t * H:(t + 1) * H] = h

    h_sc[...] = h
    c_sc[...] = c


def _pad_gate_axis(a, H, H_pad):
    """Pad the fused-gate last axis (4H) to (4*H_pad), per gate block."""
    if H_pad == H:
        return a
    lead = a.shape[:-1]
    a4 = a.reshape(lead + (4, H))
    a4 = jnp.pad(a4, [(0, 0)] * len(lead) + [(0, 0), (0, H_pad - H)])
    return a4.reshape(lead + (4 * H_pad,))


def _pick_batch_block(b_pad, max_block=256):
    if b_pad <= max_block:
        return b_pad
    for bb in range(max_block, 7, -8):
        if b_pad % bb == 0:
            return bb
    return 8


def clstm_linear_forward(x, prev_h, params, many_to_one=False,
                         matmul_dtype=jnp.bfloat16, target_chunk=32):
    """Mirrors cLSTMLinear.forward: returns (out, out_h), batch_first."""
    w_ih, w_hh, b, w_lin, b_lin = params
    if prev_h is not None:
        x = jnp.concatenate([x, prev_h], axis=2)       # cat along feature dim
    x = x.astype(jnp.float32)
    B, T, _ = x.shape
    H = w_hh.shape[0]

    # ---- padded sizes (lane/sublane alignment) --------------------------
    H_pad = -(-H // 32) * 32                 # 4*H_pad is a multiple of 128
    b_pad = max(8, -(-B // 8) * 8)           # sublane multiple
    b_block = _pick_batch_block(b_pad)
    n_b = b_pad // b_block
    # out_h block last dim t_chunk*H_pad must be a multiple of 128 lanes.
    t_mult = 128 // math.gcd(128, H_pad)

    # ---- VMEM-budget-aware time chunk -----------------------------------
    try:
        vmem_cap = int(pltpu.get_tpu_info().vmem_capacity_bytes)
    except Exception:                        # pragma: no cover - fallback
        vmem_cap = 64 << 20
    per_t = 2 * b_block * (4 * H_pad + H_pad) * 4      # dbl-buffered xp+out_h
    fixed = (H_pad * 4 * H_pad * jnp.dtype(matmul_dtype).itemsize
             + 2 * b_block * H_pad * 4 + (1 << 20))
    budget = int(0.5 * vmem_cap)
    t_cap = max(t_mult, (budget - fixed) // max(per_t, 1))
    t_chunk = min(max(T, 1), int(target_chunk), int(t_cap))
    t_chunk = -(-t_chunk // t_mult) * t_mult           # lane-alignment multiple
    T_pad = -(-T // t_chunk) * t_chunk                 # pad T, never chunk=1
    n_chunks = T_pad // t_chunk

    # ---- XLA-side input projection (kernel only does the recurrence) ----
    w_ih_p = _pad_gate_axis(w_ih, H, H_pad).astype(jnp.float32)
    b_p = _pad_gate_axis(b, H, H_pad).astype(jnp.float32)
    w_hh_p = jnp.pad(_pad_gate_axis(w_hh, H, H_pad),
                     ((0, H_pad - H), (0, 0))).astype(matmul_dtype)

    xp = jnp.dot(x, w_ih_p, preferred_element_type=jnp.float32) + b_p
    xp = jnp.pad(xp, ((0, b_pad - B), (0, T_pad - T), (0, 0)))     # zeros
    xp_flat = xp.reshape(b_pad, T_pad * 4 * H_pad)     # lane-dense kernel input

    # ---- BlockSpecs -------------------------------------------------------
    def _const_spec(shape):
        idx_map = lambda bb, c: (0,) * len(shape)
        if n_b * n_chunks > 1:
            return pl.BlockSpec(shape, idx_map, pipeline_mode=pl.Buffered(1))
        return pl.BlockSpec(shape, idx_map)

    grid_spec = pltpu.PrefetchScalarGridSpec(
        num_scalar_prefetch=0,
        grid=(n_b, n_chunks),
        in_specs=[
            pl.BlockSpec((b_block, t_chunk * 4 * H_pad),
                         lambda bb, c: (bb, c)),                 # xp chunk
            _const_spec((H_pad, 4 * H_pad)),                     # w_hh
        ],
        out_specs=pl.BlockSpec((b_block, t_chunk * H_pad),
                               lambda bb, c: (bb, c)),           # out_h chunk
        scratch_shapes=[
            pltpu.VMEM((b_block, H_pad), jnp.float32),           # h carry
            pltpu.VMEM((b_block, H_pad), jnp.float32),           # c carry
        ],
    )

    need = (2 * b_block * t_chunk * (4 * H_pad + H_pad) * 4 + fixed)
    vmem_limit = int(min(0.9 * vmem_cap, max(need + (8 << 20), 32 << 20)))

    cost = pl.CostEstimate(
        flops=int(2 * T_pad * b_pad * H_pad * 4 * H_pad
                  + 12 * T_pad * b_pad * H_pad),
        transcendentals=int(5 * T_pad * b_pad * H_pad),
        bytes_accessed=int(b_pad * T_pad * 4 * H_pad * 4
                           + b_pad * T_pad * H_pad * 4
                           + H_pad * 4 * H_pad * 2),
    )

    kernel = functools.partial(_clstm_recurrence_kernel,
                               t_chunk=t_chunk, hidden_pad=H_pad)

    out_h_flat = pl.pallas_call(
        kernel,
        out_shape=jax.ShapeDtypeStruct((b_pad, T_pad * H_pad), jnp.float32),
        grid_spec=grid_spec,
        compiler_params=pltpu.CompilerParams(
            # batch blocks independent -> parallel (both v7x TCs);
            # time carries h/c in scratch -> must stay sequential.
            dimension_semantics=("parallel", "arbitrary"),
            vmem_limit_bytes=vmem_limit),
        cost_estimate=cost,
    )(xp_flat, w_hh_p)

    # (b_pad, T_pad*H_pad) -> (B, T, H) batch_first; padded rows/steps/cols off.
    out_h = out_h_flat.reshape(b_pad, T_pad, H_pad)[:B, :T, :H]

    # Linear head in XLA (lane-sparse O stays out of the kernel).
    if many_to_one:
        out = jnp.dot(out_h[:, -1, :], w_lin,
                      preferred_element_type=jnp.float32) + b_lin[0]
    else:
        out = jnp.dot(out_h, w_lin,
                      preferred_element_type=jnp.float32) + b_lin
    return out, out_h


def _ref_forward(x, prev_h, params, many_to_one=False):
    """Pure-JAX f32 reference (lax.scan LSTM) for correctness checking."""
    w_ih, w_hh, b, w_lin, b_lin = params
    if prev_h is not None:
        x = jnp.concatenate([x, prev_h], axis=2)
    B = x.shape[0]
    H = w_hh.shape[0]
    x_tm = jnp.transpose(x, (1, 0, 2))

    def step(carry, x_t):
        h, c = carry
        gates = x_t @ w_ih + h @ w_hh + b              # (B, 4H)
        i = jax.nn.sigmoid(gates[:, 0:H])
        f = jax.nn.sigmoid(gates[:, H:2 * H])
        g = jnp.tanh(gates[:, 2 * H:3 * H])
        o = jax.nn.sigmoid(gates[:, 3 * H:4 * H])
        c = f * c + i * g
        h = o * jnp.tanh(c)
        return (h, c), h

    h0 = jnp.zeros((B, H), jnp.float32)
    c0 = jnp.zeros((B, H), jnp.float32)
    _, hs = lax.scan(step, (h0, c0), x_tm)
    out_h = jnp.transpose(hs, (1, 0, 2))
    if many_to_one:
        out = out_h[:, -1, :] @ w_lin + b_lin[0]
    else:
        out = out_h @ w_lin + b_lin
    return out, out_h


def init_params(key, input_size, hidden_size, output_size):
    """Deterministic synthetic parameters, fused-gate layout.

    Gate order along the 4H axis follows PyTorch: (input, forget, cell, output).
    """
    ks = jax.random.split(key, 6)
    bound = 1.0 / jnp.sqrt(hidden_size)
    w_ih = jax.random.uniform(ks[0], (input_size, 4 * hidden_size),
                              jnp.float32, -bound, bound)
    w_hh = jax.random.uniform(ks[1], (hidden_size, 4 * hidden_size),
                              jnp.float32, -bound, bound)
    # combined b_ih + b_hh, one fused (1, 4H) row
    b = (jax.random.uniform(ks[2], (1, 4 * hidden_size), jnp.float32,
                            -bound, bound)
         + jax.random.uniform(ks[3], (1, 4 * hidden_size), jnp.float32,
                              -bound, bound))
    lin_bound = 1.0 / jnp.sqrt(hidden_size)
    w_lin = jax.random.uniform(ks[4], (hidden_size, output_size),
                               jnp.float32, -lin_bound, lin_bound)
    b_lin = jax.random.uniform(ks[5], (1, output_size),
                               jnp.float32, -lin_bound, lin_bound)
    return (w_ih, w_hh, b, w_lin, b_lin)


if __name__ == "__main__":
    # Small shapes consistent with the module:
    # x: (B, T, 2), prev_h: (B, T, 2) -> LSTM input_size = 4; hidden = 32
    # (so the fused gate width 4H = 128 = one vreg lane width).
    B, T = 2, 8
    X_FEAT, PREV_FEAT = 2, 2
    INPUT_SIZE = X_FEAT + PREV_FEAT
    HIDDEN = 32
    OUTPUT = 2

    key = jax.random.PRNGKey(0)
    kx, kp, kw = jax.random.split(key, 3)
    x = jax.random.normal(kx, (B, T, X_FEAT), jnp.float32)
    prev_h = jax.random.normal(kp, (B, T, PREV_FEAT), jnp.float32)
    params = init_params(kw, INPUT_SIZE, HIDDEN, OUTPUT)

    fwd = jax.jit(functools.partial(clstm_linear_forward, many_to_one=False))
    out, out_h = fwd(x, prev_h, params)
    jax.block_until_ready((out, out_h))

    # Correctness vs. pure-f32 reference (kernel uses bf16 recurrent matmul
    # operands with f32 accumulation and f32 h/c carries -> relaxed tolerance).
    ref_out, ref_out_h = _ref_forward(x, prev_h, params, many_to_one=False)
    assert out.shape == (B, T, OUTPUT)
    assert out_h.shape == (B, T, HIDDEN)
    assert jnp.allclose(out, ref_out, atol=2e-2, rtol=2e-2)
    assert jnp.allclose(out_h, ref_out_h, atol=2e-2, rtol=2e-2)

    # Also exercise the many_to_one path (projects only the last hidden state).
    fwd_m2o = jax.jit(functools.partial(clstm_linear_forward, many_to_one=True))
    out_m, out_h_m = fwd_m2o(x, prev_h, params)
    jax.block_until_ready((out_m, out_h_m))
    ref_out_m, _ = _ref_forward(x, prev_h, params, many_to_one=True)
    assert out_m.shape == (B, OUTPUT)
    assert out_h_m.shape == (B, T, HIDDEN)
    assert jnp.allclose(out_m, ref_out_m, atol=2e-2, rtol=2e-2)

    print("KERNEL_OK")
</pallas_src>

<mosaic_0001>
module attributes {stable_mosaic.version = 11 : i64} {
  func.func @_clstm_recurrence_kernel(%arg0: i32, %arg1: i32, %arg2: memref<8x1024xf32, #tpu.memory_space<vmem>>, %arg3: memref<32x128xbf16, #tpu.memory_space<vmem>>, %arg4: memref<8x256xf32, #tpu.memory_space<vmem>>, %arg5: memref<8x32xf32, #tpu.memory_space<vmem>>, %arg6: memref<8x32xf32, #tpu.memory_space<vmem>>) attributes {dimension_semantics = [#tpu.dimension_semantics<parallel>, #tpu.dimension_semantics<arbitrary>], iteration_bounds = array<i64: 1, 1>, scalar_prefetch = 0 : i64, scratch_operands = 2 : i64, tpu.core_type = #tpu.core_type<tc>, window_params = [{transform_indices = @transform_0, window_bounds = array<i64: 8, 1024>}, {pipeline_mode = #tpu.pipeline_mode<synchronous>, transform_indices = @transform_1, window_bounds = array<i64: 32, 128>}, {transform_indices = @transform_2, window_bounds = array<i64: 8, 256>}]} {
    %c0_i32 = arith.constant 0 : i32
    %0 = arith.cmpi eq, %arg1, %c0_i32 : i32
    %1 = arith.extui %0 : i1 to i32
    %c0_i32_0 = arith.constant 0 : i32
    %2 = arith.cmpi ne, %1, %c0_i32_0 : i32
    scf.if %2 {
      %cst_44 = arith.constant 0.000000e+00 : f32
      %168 = vector.broadcast %cst_44 : f32 to vector<8x32xf32>
      %c0_45 = arith.constant 0 : index
      %c0_46 = arith.constant 0 : index
      %169 = vector.load %arg5[%c0_45, %c0_46] : memref<8x32xf32, #tpu.memory_space<vmem>>, vector<8x32xf32>
      tpu.vector_store %arg5[%c0_45, %c0_46], %168 {strides = array<i32>} : memref<8x32xf32, #tpu.memory_space<vmem>>, vector<8x32xf32>,
      %cst_47 = arith.constant 0.000000e+00 : f32
      %170 = vector.broadcast %cst_47 : f32 to vector<8x32xf32>
      %c0_48 = arith.constant 0 : index
      %c0_49 = arith.constant 0 : index
      %171 = vector.load %arg6[%c0_48, %c0_49] : memref<8x32xf32, #tpu.memory_space<vmem>>, vector<8x32xf32>
      tpu.vector_store %arg6[%c0_48, %c0_49], %170 {strides = array<i32>} : memref<8x32xf32, #tpu.memory_space<vmem>>, vector<8x32xf32>,
    } else {
    }
    %c0 = arith.constant 0 : index
    %c0_1 = arith.constant 0 : index
    %3 = vector.load %arg3[%c0, %c0_1] : memref<32x128xbf16, #tpu.memory_space<vmem>>, vector<32x128xbf16>
    %c0_2 = arith.constant 0 : index
    %c0_3 = arith.constant 0 : index
    %4 = vector.load %arg5[%c0_2, %c0_3] : memref<8x32xf32, #tpu.memory_space<vmem>>, vector<8x32xf32>
    %c0_4 = arith.constant 0 : index
    %c0_5 = arith.constant 0 : index
    %5 = vector.load %arg6[%c0_4, %c0_5] : memref<8x32xf32, #tpu.memory_space<vmem>>, vector<8x32xf32>
    %c0_6 = arith.constant 0 : index
    %c0_7 = arith.constant 0 : index
    %6 = vector.load %arg2[%c0_6, %c0_7] : memref<8x1024xf32, #tpu.memory_space<vmem>>, vector<8x128xf32>
    %7 = arith.truncf %4 : vector<8x32xf32> to vector<8x32xbf16>
    %cst = arith.constant dense<0.000000e+00> : vector<8x128xf32>
    %8 = tpu.matmul %7, %3, %cst {dimension_numbers = #tpu.dot_dimension_numbers<[1], [0], [0], [1], [0, 0, 1, 1], [], []>} : vector<8x32xbf16>, vector<32x128xbf16>, vector<8x128xf32> -> vector<8x128xf32>
    %9 = arith.addf %6, %8 : vector<8x128xf32>
    %10 = arith.negf %9 : vector<8x128xf32>
    %11 = math.exp %10 : vector<8x128xf32>
    %cst_8 = arith.constant 1.000000e+00 : f32
    %12 = vector.broadcast %cst_8 : f32 to vector<8x128xf32>
    %13 = arith.addf %12, %11 : vector<8x128xf32>
    %14 = arith.divf %12, %13 : vector<8x128xf32>
    %15 = math.tanh %9 : vector<8x128xf32>
    %16 = vector.extract_strided_slice %14 {offsets = [0, 0], sizes = [8, 32], strides = [1, 1]} : vector<8x128xf32> to vector<8x32xf32>
    %17 = vector.extract_strided_slice %14 {offsets = [0, 32], sizes = [8, 32], strides = [1, 1]} : vector<8x128xf32> to vector<8x32xf32>
    %18 = vector.extract_strided_slice %15 {offsets = [0, 64], sizes = [8, 32], strides = [1, 1]} : vector<8x128xf32> to vector<8x32xf32>
    %19 = vector.extract_strided_slice %14 {offsets = [0, 96], sizes = [8, 32], strides = [1, 1]} : vector<8x128xf32> to vector<8x32xf32>
    %20 = arith.mulf %17, %5 : vector<8x32xf32>
    %21 = arith.mulf %16, %18 : vector<8x32xf32>
    %22 = arith.addf %20, %21 : vector<8x32xf32>
    %23 = math.tanh %22 : vector<8x32xf32>
    %24 = arith.mulf %19, %23 : vector<8x32xf32>
    %c0_9 = arith.constant 0 : index
    %c0_10 = arith.constant 0 : index
    %25 = vector.load %arg4[%c0_9, %c0_10] : memref<8x256xf32, #tpu.memory_space<vmem>>, vector<8x32xf32>
    tpu.vector_store %arg4[%c0_9, %c0_10], %24 {strides = array<i32>} : memref<8x256xf32, #tpu.memory_space<vmem>>, vector<8x32xf32>,
    %c0_11 = arith.constant 0 : index
    %c128 = arith.constant 128 : index
    %26 = vector.load %arg2[%c0_11, %c128] : memref<8x1024xf32, #tpu.memory_space<vmem>>, vector<8x128xf32>
    %27 = arith.truncf %24 : vector<8x32xf32> to vector<8x32xbf16>
    %cst_12 = arith.constant dense<0.000000e+00> : vector<8x128xf32>
    %28 = tpu.matmul %27, %3, %cst_12 {dimension_numbers = #tpu.dot_dimension_numbers<[1], [0], [0], [1], [0, 0, 1, 1], [], []>} : vector<8x32xbf16>, vector<32x128xbf16>, vector<8x128xf32> -> vector<8x128xf32>
    %29 = arith.addf %26, %28 : vector<8x128xf32>
    %30 = arith.negf %29 : vector<8x128xf32>
    %31 = math.exp %30 : vector<8x128xf32>
    %cst_13 = arith.constant 1.000000e+00 : f32
    %32 = vector.broadcast %cst_13 : f32 to vector<8x128xf32>
    %33 = arith.addf %32, %31 : vector<8x128xf32>
    %34 = arith.divf %32, %33 : vector<8x128xf32>
    %35 = math.tanh %29 : vector<8x128xf32>
    %36 = vector.extract_strided_slice %34 {offsets = [0, 0], sizes = [8, 32], strides = [1, 1]} : vector<8x128xf32> to vector<8x32xf32>
    %37 = vector.extract_strided_slice %34 {offsets = [0, 32], sizes = [8, 32], strides = [1, 1]} : vector<8x128xf32> to vector<8x32xf32>
    %38 = vector.extract_strided_slice %35 {offsets = [0, 64], sizes = [8, 32], strides = [1, 1]} : vector<8x128xf32> to vector<8x32xf32>
    %39 = vector.extract_strided_slice %34 {offsets = [0, 96], sizes = [8, 32], strides = [1, 1]} : vector<8x128xf32> to vector<8x32xf32>
    %40 = arith.mulf %37, %22 : vector<8x32xf32>
    %41 = arith.mulf %36, %38 : vector<8x32xf32>
    %42 = arith.addf %40, %41 : vector<8x32xf32>
    %43 = math.tanh %42 : vector<8x32xf32>
    %44 = arith.mulf %39, %43 : vector<8x32xf32>
    %c0_14 = arith.constant 0 : index
    %c32 = arith.constant 32 : index
    %45 = vector.load %arg4[%c0_14, %c32] : memref<8x256xf32, #tpu.memory_space<vmem>>, vector<8x32xf32>
    tpu.vector_store %arg4[%c0_14, %c32], %44 {strides = array<i32>} : memref<8x256xf32, #tpu.memory_space<vmem>>, vector<8x32xf32>,
    %c0_15 = arith.constant 0 : index
    %c256 = arith.constant 256 : index
    %46 = vector.load %arg2[%c0_15, %c256] : memref<8x1024xf32, #tpu.memory_space<vmem>>, vector<8x128xf32>
    %47 = arith.truncf %44 : vector<8x32xf32> to vector<8x32xbf16>
    %cst_16 = arith.constant dense<0.000000e+00> : vector<8x128xf32>
    %48 = tpu.matmul %47, %3, %cst_16 {dimension_numbers = #tpu.dot_dimension_numbers<[1], [0], [0], [1], [0, 0, 1, 1], [], []>} : vector<8x32xbf16>, vector<32x128xbf16>, vector<8x128xf32> -> vector<8x128xf32>
    %49 = arith.addf %46, %48 : vector<8x128xf32>
    %50 = arith.negf %49 : vector<8x128xf32>
    %51 = math.exp %50 : vector<8x128xf32>
    %cst_17 = arith.constant 1.000000e+00 : f32
    %52 = vector.broadcast %cst_17 : f32 to vector<8x128xf32>
    %53 = arith.addf %52, %51 : vector<8x128xf32>
    %54 = arith.divf %52, %53 : vector<8x128xf32>
    %55 = math.tanh %49 : vector<8x128xf32>
    %56 = vector.extract_strided_slice %54 {offsets = [0, 0], sizes = [8, 32], strides = [1, 1]} : vector<8x128xf32> to vector<8x32xf32>
    %57 = vector.extract_strided_slice %54 {offsets = [0, 32], sizes = [8, 32], strides = [1, 1]} : vector<8x128xf32> to vector<8x32xf32>
    %58 = vector.extract_strided_slice %55 {offsets = [0, 64], sizes = [8, 32], strides = [1, 1]} : vector<8x128xf32> to vector<8x32xf32>
    %59 = vector.extract_strided_slice %54 {offsets = [0, 96], sizes = [8, 32], strides = [1, 1]} : vector<8x128xf32> to vector<8x32xf32>
    %60 = arith.mulf %57, %42 : vector<8x32xf32>
    %61 = arith.mulf %56, %58 : vector<8x32xf32>
    %62 = arith.addf %60, %61 : vector<8x32xf32>
    %63 = math.tanh %62 : vector<8x32xf32>
    %64 = arith.mulf %59, %63 : vector<8x32xf32>
    %c0_18 = arith.constant 0 : index
    %c64 = arith.constant 64 : index
    %65 = vector.load %arg4[%c0_18, %c64] : memref<8x256xf32, #tpu.memory_space<vmem>>, vector<8x32xf32>
    tpu.vector_store %arg4[%c0_18, %c64], %64 {strides = array<i32>} : memref<8x256xf32, #tpu.memory_space<vmem>>, vector<8x32xf32>,
    %c0_19 = arith.constant 0 : index
    %c384 = arith.constant 384 : index
    %66 = vector.load %arg2[%c0_19, %c384] : memref<8x1024xf32, #tpu.memory_space<vmem>>, vector<8x128xf32>
    %67 = arith.truncf %64 : vector<8x32xf32> to vector<8x32xbf16>
    %cst_20 = arith.constant dense<0.000000e+00> : vector<8x128xf32>
    %68 = tpu.matmul %67, %3, %cst_20 {dimension_numbers = #tpu.dot_dimension_numbers<[1], [0], [0], [1], [0, 0, 1, 1], [], []>} : vector<8x32xbf16>, vector<32x128xbf16>, vector<8x128xf32> -> vector<8x128xf32>
    %69 = arith.addf %66, %68 : vector<8x128xf32>
    %70 = arith.negf %69 : vector<8x128xf32>
    %71 = math.exp %70 : vector<8x128xf32>
    %cst_21 = arith.constant 1.000000e+00 : f32
    %72 = vector.broadcast %cst_21 : f32 to vector<8x128xf32>
    %73 = arith.addf %72, %71 : vector<8x128xf32>
    %74 = arith.divf %72, %73 : vector<8x128xf32>
    %75 = math.tanh %69 : vector<8x128xf32>
    %76 = vector.extract_strided_slice %74 {offsets = [0, 0], sizes = [8, 32], strides = [1, 1]} : vector<8x128xf32> to vector<8x32xf32>
    %77 = vector.extract_strided_slice %74 {offsets = [0, 32], sizes = [8, 32], strides = [1, 1]} : vector<8x128xf32> to vector<8x32xf32>
    %78 = vector.extract_strided_slice %75 {offsets = [0, 64], sizes = [8, 32], strides = [1, 1]} : vector<8x128xf32> to vector<8x32xf32>
    %79 = vector.extract_strided_slice %74 {offsets = [0, 96], sizes = [8, 32], strides = [1, 1]} : vector<8x128xf32> to vector<8x32xf32>
    %80 = arith.mulf %77, %62 : vector<8x32xf32>
    %81 = arith.mulf %76, %78 : vector<8x32xf32>
    %82 = arith.addf %80, %81 : vector<8x32xf32>
    %83 = math.tanh %82 : vector<8x32xf32>
    %84 = arith.mulf %79, %83 : vector<8x32xf32>
    %c0_22 = arith.constant 0 : index
    %c96 = arith.constant 96 : index
    %85 = vector.load %arg4[%c0_22, %c96] : memref<8x256xf32, #tpu.memory_space<vmem>>, vector<8x32xf32>
    tpu.vector_store %arg4[%c0_22, %c96], %84 {strides = array<i32>} : memref<8x256xf32, #tpu.memory_space<vmem>>, vector<8x32xf32>,
    %c0_23 = arith.constant 0 : index
    %c512 = arith.constant 512 : index
    %86 = vector.load %arg2[%c0_23, %c512] : memref<8x1024xf32, #tpu.memory_space<vmem>>, vector<8x128xf32>
    %87 = arith.truncf %84 : vector<8x32xf32> to vector<8x32xbf16>
    %cst_24 = arith.constant dense<0.000000e+00> : vector<8x128xf32>
    %88 = tpu.matmul %87, %3, %cst_24 {dimension_numbers = #tpu.dot_dimension_numbers<[1], [0], [0], [1], [0, 0, 1, 1], [], []>} : vector<8x32xbf16>, vector<32x128xbf16>, vector<8x128xf32> -> vector<8x128xf32>
    %89 = arith.addf %86, %88 : vector<8x128xf32>
    %90 = arith.negf %89 : vector<8x128xf32>
    %91 = math.exp %90 : vector<8x128xf32>
    %cst_25 = arith.constant 1.000000e+00 : f32
    %92 = vector.broadcast %cst_25 : f32 to vector<8x128xf32>
    %93 = arith.addf %92, %91 : vector<8x128xf32>
    %94 = arith.divf %92, %93 : vector<8x128xf32>
    %95 = math.tanh %89 : vector<8x128xf32>
    %96 = vector.extract_strided_slice %94 {offsets = [0, 0], sizes = [8, 32], strides = [1, 1]} : vector<8x128xf32> to vector<8x32xf32>
    %97 = vector.extract_strided_slice %94 {offsets = [0, 32], sizes = [8, 32], strides = [1, 1]} : vector<8x128xf32> to vector<8x32xf32>
    %98 = vector.extract_strided_slice %95 {offsets = [0, 64], sizes = [8, 32], strides = [1, 1]} : vector<8x128xf32> to vector<8x32xf32>
    %99 = vector.extract_strided_slice %94 {offsets = [0, 96], sizes = [8, 32], strides = [1, 1]} : vector<8x128xf32> to vector<8x32xf32>
    %100 = arith.mulf %97, %82 : vector<8x32xf32>
    %101 = arith.mulf %96, %98 : vector<8x32xf32>
    %102 = arith.addf %100, %101 : vector<8x32xf32>
    %103 = math.tanh %102 : vector<8x32xf32>
    %104 = arith.mulf %99, %103 : vector<8x32xf32>
    %c0_26 = arith.constant 0 : index
    %c128_27 = arith.constant 128 : index
    %105 = vector.load %arg4[%c0_26, %c128_27] : memref<8x256xf32, #tpu.memory_space<vmem>>, vector<8x32xf32>
    tpu.vector_store %arg4[%c0_26, %c128_27], %104 {strides = array<i32>} : memref<8x256xf32, #tpu.memory_space<vmem>>, vector<8x32xf32>,
    %c0_28 = arith.constant 0 : index
    %c640 = arith.constant 640 : index
    %106 = vector.load %arg2[%c0_28, %c640] : memref<8x1024xf32, #tpu.memory_space<vmem>>, vector<8x128xf32>
    %107 = arith.truncf %104 : vector<8x32xf32> to vector<8x32xbf16>
    %cst_29 = arith.constant dense<0.000000e+00> : vector<8x128xf32>
    %108 = tpu.matmul %107, %3, %cst_29 {dimension_numbers = #tpu.dot_dimension_numbers<[1], [0], [0], [1], [0, 0, 1, 1], [], []>} : vector<8x32xbf16>, vector<32x128xbf16>, vector<8x128xf32> -> vector<8x128xf32>
    %109 = arith.addf %106, %108 : vector<8x128xf32>
    %110 = arith.negf %109 : vector<8x128xf32>
    %111 = math.exp %110 : vector<8x128xf32>
    %cst_30 = arith.constant 1.000000e+00 : f32
    %112 = vector.broadcast %cst_30 : f32 to vector<8x128xf32>
    %113 = arith.addf %112, %111 : vector<8x128xf32>
    %114 = arith.divf %112, %113 : vector<8x128xf32>
    %115 = math.tanh %109 : vector<8x128xf32>
    %116 = vector.extract_strided_slice %114 {offsets = [0, 0], sizes = [8, 32], strides = [1, 1]} : vector<8x128xf32> to vector<8x32xf32>
    %117 = vector.extract_strided_slice %114 {offsets = [0, 32], sizes = [8, 32], strides = [1, 1]} : vector<8x128xf32> to vector<8x32xf32>
    %118 = vector.extract_strided_slice %115 {offsets = [0, 64], sizes = [8, 32], strides = [1, 1]} : vector<8x128xf32> to vector<8x32xf32>
    %119 = vector.extract_strided_slice %114 {offsets = [0, 96], sizes = [8, 32], strides = [1, 1]} : vector<8x128xf32> to vector<8x32xf32>
    %120 = arith.mulf %117, %102 : vector<8x32xf32>
    %121 = arith.mulf %116, %118 : vector<8x32xf32>
    %122 = arith.addf %120, %121 : vector<8x32xf32>
    %123 = math.tanh %122 : vector<8x32xf32>
    %124 = arith.mulf %119, %123 : vector<8x32xf32>
    %c0_31 = arith.constant 0 : index
    %c160 = arith.constant 160 : index
    %125 = vector.load %arg4[%c0_31, %c160] : memref<8x256xf32, #tpu.memory_space<vmem>>, vector<8x32xf32>
    tpu.vector_store %arg4[%c0_31, %c160], %124 {strides = array<i32>} : memref<8x256xf32, #tpu.memory_space<vmem>>, vector<8x32xf32>,
    %c0_32 = arith.constant 0 : index
    %c768 = arith.constant 768 : index
    %126 = vector.load %arg2[%c0_32, %c768] : memref<8x1024xf32, #tpu.memory_space<vmem>>, vector<8x128xf32>
    %127 = arith.truncf %124 : vector<8x32xf32> to vector<8x32xbf16>
    %cst_33 = arith.constant dense<0.000000e+00> : vector<8x128xf32>
    %128 = tpu.matmul %127, %3, %cst_33 {dimension_numbers = #tpu.dot_dimension_numbers<[1], [0], [0], [1], [0, 0, 1, 1], [], []>} : vector<8x32xbf16>, vector<32x128xbf16>, vector<8x128xf32> -> vector<8x128xf32>
    %129 = arith.addf %126, %128 : vector<8x128xf32>
    %130 = arith.negf %129 : vector<8x128xf32>
    %131 = math.exp %130 : vector<8x128xf32>
    %cst_34 = arith.constant 1.000000e+00 : f32
    %132 = vector.broadcast %cst_34 : f32 to vector<8x128xf32>
    %133 = arith.addf %132, %131 : vector<8x128xf32>
    %134 = arith.divf %132, %133 : vector<8x128xf32>
    %135 = math.tanh %129 : vector<8x128xf32>
    %136 = vector.extract_strided_slice %134 {offsets = [0, 0], sizes = [8, 32], strides = [1, 1]} : vector<8x128xf32> to vector<8x32xf32>
    %137 = vector.extract_strided_slice %134 {offsets = [0, 32], sizes = [8, 32], strides = [1, 1]} : vector<8x128xf32> to vector<8x32xf32>
    %138 = vector.extract_strided_slice %135 {offsets = [0, 64], sizes = [8, 32], strides = [1, 1]} : vector<8x128xf32> to vector<8x32xf32>
    %139 = vector.extract_strided_slice %134 {offsets = [0, 96], sizes = [8, 32], strides = [1, 1]} : vector<8x128xf32> to vector<8x32xf32>
    %140 = arith.mulf %137, %122 : vector<8x32xf32>
    %141 = arith.mulf %136, %138 : vector<8x32xf32>
    %142 = arith.addf %140, %141 : vector<8x32xf32>
    %143 = math.tanh %142 : vector<8x32xf32>
    %144 = arith.mulf %139, %143 : vector<8x32xf32>
    %c0_35 = arith.constant 0 : index
    %c192 = arith.constant 192 : index
    %145 = vector.load %arg4[%c0_35, %c192] : memref<8x256xf32, #tpu.memory_space<vmem>>, vector<8x32xf32>
    tpu.vector_store %arg4[%c0_35, %c192], %144 {strides = array<i32>} : memref<8x256xf32, #tpu.memory_space<vmem>>, vector<8x32xf32>,
    %c0_36 = arith.constant 0 : index
    %c896 = arith.constant 896 : index
    %146 = vector.load %arg2[%c0_36, %c896] : memref<8x1024xf32, #tpu.memory_space<vmem>>, vector<8x128xf32>
    %147 = arith.truncf %144 : vector<8x32xf32> to vector<8x32xbf16>
    %cst_37 = arith.constant dense<0.000000e+00> : vector<8x128xf32>
    %148 = tpu.matmul %147, %3, %cst_37 {dimension_numbers = #tpu.dot_dimension_numbers<[1], [0], [0], [1], [0, 0, 1, 1], [], []>} : vector<8x32xbf16>, vector<32x128xbf16>, vector<8x128xf32> -> vector<8x128xf32>
    %149 = arith.addf %146, %148 : vector<8x128xf32>
    %150 = arith.negf %149 : vector<8x128xf32>
    %151 = math.exp %150 : vector<8x128xf32>
    %cst_38 = arith.constant 1.000000e+00 : f32
    %152 = vector.broadcast %cst_38 : f32 to vector<8x128xf32>
    %153 = arith.addf %152, %151 : vector<8x128xf32>
    %154 = arith.divf %152, %153 : vector<8x128xf32>
    %155 = math.tanh %149 : vector<8x128xf32>
    %156 = vector.extract_strided_slice %154 {offsets = [0, 0], sizes = [8, 32], strides = [1, 1]} : vector<8x128xf32> to vector<8x32xf32>
    %157 = vector.extract_strided_slice %154 {offsets = [0, 32], sizes = [8, 32], strides = [1, 1]} : vector<8x128xf32> to vector<8x32xf32>
    %158 = vector.extract_strided_slice %155 {offsets = [0, 64], sizes = [8, 32], strides = [1, 1]} : vector<8x128xf32> to vector<8x32xf32>
    %159 = vector.extract_strided_slice %154 {offsets = [0, 96], sizes = [8, 32], strides = [1, 1]} : vector<8x128xf32> to vector<8x32xf32>
    %160 = arith.mulf %157, %142 : vector<8x32xf32>
    %161 = arith.mulf %156, %158 : vector<8x32xf32>
    %162 = arith.addf %160, %161 : vector<8x32xf32>
    %163 = math.tanh %162 : vector<8x32xf32>
    %164 = arith.mulf %159, %163 : vector<8x32xf32>
    %c0_39 = arith.constant 0 : index
    %c224 = arith.constant 224 : index
    %165 = vector.load %arg4[%c0_39, %c224] : memref<8x256xf32, #tpu.memory_space<vmem>>, vector<8x32xf32>
    tpu.vector_store %arg4[%c0_39, %c224], %164 {strides = array<i32>} : memref<8x256xf32, #tpu.memory_space<vmem>>, vector<8x32xf32>,
    %c0_40 = arith.constant 0 : index
    %c0_41 = arith.constant 0 : index
    %166 = vector.load %arg5[%c0_40, %c0_41] : memref<8x32xf32, #tpu.memory_space<vmem>>, vector<8x32xf32>
    tpu.vector_store %arg5[%c0_40, %c0_41], %164 {strides = array<i32>} : memref<8x32xf32, #tpu.memory_space<vmem>>, vector<8x32xf32>,
    %c0_42 = arith.constant 0 : index
    %c0_43 = arith.constant 0 : index
    %167 = vector.load %arg6[%c0_42, %c0_43] : memref<8x32xf32, #tpu.memory_space<vmem>>, vector<8x32xf32>
    tpu.vector_store %arg6[%c0_42, %c0_43], %162 {strides = array<i32>} : memref<8x32xf32, #tpu.memory_space<vmem>>, vector<8x32xf32>,
    return
  }
  func.func @transform_0(%arg0: i32, %arg1: i32) -> (i32, i32) {
    %c0_i32 = arith.constant 0 : i32
    return %arg0, %arg1 : i32, i32
  }
  func.func @transform_1(%arg0: i32, %arg1: i32) -> (i32, i32) {
    %c0_i32 = arith.constant 0 : i32
    %c0_i32_0 = arith.constant 0 : i32
    %c0_i32_1 = arith.constant 0 : i32
    return %c0_i32, %c0_i32_0 : i32, i32
  }
  func.func @transform_2(%arg0: i32, %arg1: i32) -> (i32, i32) {
    %c0_i32 = arith.constant 0 : i32
    return %arg0, %arg1 : i32, i32
  }
}

</mosaic_0001>

<bundles_post_ra>
// kernel: clstm_linear_forward.1
= control target key start
LH: loop header
LB: loop body
LE: loop exit
PB: predicated region body
PF: predicated region fallthrough
CT: control target
= control target key end

     0   :  { %vm16_vm0 = vcmask 261120   ;;  %v849_v0 = vmov 0.0   ;;  %vm850_vm1 = vmmov 0   ;;  %s851_s14 = smov 64   ;;  %s852_s15 = smov 32   ;;  %vm194_vm2 = vcmask 523520   ;;  %s1064_s1 = inlined_call_operand.vmem [shape: bf16[32,128], index: 1, kind: input, shape index: {}]   ;;  %s1065_s0 = inlined_call_operand.vmem [shape: f32[8,1024], index: 0, kind: input, shape index: {}]   ;;  %s1066_s2 = inlined_call_operand.vmem [shape: f32[8,256], index: 2, kind: output, shape index: {}]  }
   0x1   :  { %714 = vmatprep.subr.bf16.mxu0 %v849_v0  ;;  %v873_v1 = vld [vmem:[%s1064_s1 + $0x8] sm:$0xff]   ;;  %718 = vmatprep.mubr.msk.bf16.mxu0 %vm850_vm1, %v849_v0  ;;  %17 = vst.msk [vmem:[#allocation2] sm:$0xff] %vm16_vm0, %v849_v0  ;;  %18 = vst.msk [vmem:[#allocation3] sm:$0xff] %vm16_vm0, %v849_v0  ;;  %v888_v2 = vld [vmem:[%s1064_s1] sm:$0xff]   ;;  %vm273_vm3 = vcmask 785920   ;;  %vm348_vm4 = vcmask 1048320  }
   0x2   :  { %722 = vmatprep.subr.bf16.mxu1 %v849_v0  ;;  %726 = vmatprep.mubr.msk.bf16.mxu1 %vm850_vm1, %v849_v0  ;;  %v25_v5 = vld [vmem:[%s1065_s0] sm:$0xff]  ;;  %v117_v28 = vld [vmem:[%s1065_s0 + $0x8] sm:$0xff]  ;;  %v196_v49 = vld [vmem:[%s1065_s0 + $0x10] sm:$0xff] }
   0x3   :  { %715 = vmatpush3.bf16.msra.mxu0 %v873_v1  ;;  %723 = vmatpush3.bf16.msra.mxu1 %v873_v1 }
   0x4   :  { %716 = vmatprep.subr.bf16.mxu0 %v849_v0  ;;  %724 = vmatprep.subr.bf16.mxu1 %v849_v0 }
   0x7   :  { %717 = vmatpush3.bf16.msra.mxu0 %v888_v2  ;;  %725 = vmatpush3.bf16.msra.mxu1 %v888_v2 }
   0x8   :  { %v23_v3 = vld [vmem:[#allocation2] sm:$0xff]  ;;  %730 = vmatprep.subr.bf16.mxu0 %v849_v0  ;;  %738 = vmatprep.subr.bf16.mxu1 %v849_v0  ;;  %v24_v12 = vld [vmem:[#allocation3] sm:$0xff] }
   0x9   :  { %v26_v4 = vpack.c.bf16 %v23_v3, %v23_v3 }
   0xb   :  { %719 = vmatmul.mubr.msk.bf16.vlgmr.msra.gmra.mxu0 %vm16_vm0, %v26_v4 }
   0xc   :  { %731 = vmatpush3.bf16.msra.mxu0 %v873_v1  ;;  %734 = vmatprep.mubr.msk.bf16.mxu0 %vm850_vm1, %v849_v0 }
   0xd   :  { %732 = vmatprep.subr.bf16.mxu0 %v849_v0 }
  0x10   :  { %733 = vmatpush3.bf16.msra.mxu0 %v888_v2 }
  0x11   :  { %746 = vmatprep.subr.bf16.mxu0 %v849_v0 }
  0xcb   :  { %v77_v6 = vpop.f32.mrf.mxu0 }
  0xcc   :  { %v83_v7 = vadd.f32 %v77_v6, %v25_v5 }
  0xcd   :  { %v720_v8 = vpop.f32.mrf.mxu0 }
  0xce   :  { %785 = vtanh.f32 %v83_v7  ;;  %v675_v13 = vmul.f32 -1.442695, %v83_v7 }
  0xcf   :  { %v80_v9 = vpop.f32.mrf.mxu0 }
  0xd0   :  { %787 = vpow2.f32 %v675_v13  ;;  %v275_v9 = vld [vmem:[%s1065_s0 + $0x18] sm:$0xff] }
  0xd1   :  { %v721_v10 = vpop.f32.mrf.mxu0 }
  0xdb   :  { %v786_v11 = vpop.eup %785 }
  0xdc   :  { %97 = vrot.lane.b32.xlu0 %v786_v11, %s851_s14 }
  0xdd   :  { %v788_v14 = vpop.eup %787 }
  0xde   :  { %v87_v15 = vadd.f32 1.0, %v788_v14 }
  0xe0   :  { %92 = vrot.lane.b32.xlu0 %v24_v12, %s852_s15  ;;  %789 = vrcp.f32 %v87_v15 }
  0xed   :  { %v790_v16 = vpop.eup %789 }
 0x14e   :  { %v98_v17 = vpop.permute.xlu0 %97 }
 0x14f   :  { %v100_v18 = vmul.f32 %v790_v16, %v98_v17 }
 0x151   :  { %102 = vrot.lane.b32.xlu1 %v100_v18, %s852_s15 }
 0x152   :  { %v93_v19 = vpop.permute.xlu0 %92 }
 0x153   :  { %v95_v20 = vmul.f32 %v790_v16, %v93_v19 }
 0x1c3   :  { %v103_v21 = vpop.permute.xlu1 %102 }
 0x1c4   :  { %v105_v22 = vadd.f32 %v103_v21, %v95_v20 }
 0x1c6   :  { %791 = vtanh.f32 %v105_v22 }
 0x1d3   :  { %v792_v23 = vpop.eup %791 }
 0x1d4   :  { %108 = vrot.lane.b32.xlu1 %v792_v23, %s851_s14 }
 0x246   :  { %v109_v24 = vpop.permute.xlu1 %108 }
 0x247   :  { %v911_v25 = vmul.f32 %v790_v16, %v109_v24 }
 0x249   :  { %v118_v26 = vpack.c.bf16 %v911_v25, %v911_v25 }
 0x24b   :  { %120 = vrot.lane.b32.xlu0 %v118_v26, %s852_s15 }
 0x2bd   :  { %v121_v27 = vpop.permute.xlu0 %120 }
 0x2be   :  { %727 = vmatmul.mubr.msk.bf16.vlgmr.msra.gmra.mxu1 %vm16_vm0, %v121_v27 }
 0x2bf   :  { %739 = vmatpush3.bf16.msra.mxu1 %v873_v1  ;;  %742 = vmatprep.mubr.msk.bf16.mxu1 %vm850_vm1, %v849_v0 }
 0x2c0   :  { %740 = vmatprep.subr.bf16.mxu1 %v849_v0 }
 0x2c3   :  { %741 = vmatpush3.bf16.msra.mxu1 %v888_v2 }
 0x2c4   :  { %754 = vmatprep.subr.bf16.mxu1 %v849_v0 }
 0x37e   :  { %v159_v29 = vpop.f32.mrf.mxu1 }
 0x37f   :  { %v165_v30 = vadd.f32 %v159_v29, %v117_v28 }
 0x380   :  { %v728_v31 = vpop.f32.mrf.mxu1 }
 0x381   :  { %793 = vtanh.f32 %v165_v30  ;;  %v677_v35 = vmul.f32 -1.442695, %v165_v30  ;;  %v350_v31 = vld [vmem:[%s1065_s0 + $0x20] sm:$0xff] }
 0x382   :  { %v162_v32 = vpop.f32.mrf.mxu1 }
 0x383   :  { %795 = vpow2.f32 %v677_v35 }
 0x384   :  { %v729_v33 = vpop.f32.mrf.mxu1 }
 0x38e   :  { %v794_v34 = vpop.eup %793 }
 0x38f   :  { %175 = vrot.lane.b32.xlu1 %v794_v34, %s851_s14 }
 0x390   :  { %v796_v36 = vpop.eup %795 }
 0x391   :  { %v169_v37 = vadd.f32 1.0, %v796_v36 }
 0x393   :  { %797 = vrcp.f32 %v169_v37 }
 0x3a0   :  { %v798_v38 = vpop.eup %797 }
 0x3a1   :  { %v173_v41 = vmul.f32 %v798_v38, %v105_v22 }
 0x401   :  { %v176_v39 = vpop.permute.xlu1 %175 }
 0x402   :  { %v178_v40 = vmul.f32 %v798_v38, %v176_v39 }
 0x404   :  { %180 = vrot.lane.b32.xlu0 %v178_v40, %s852_s15 }
 0x476   :  { %v181_v42 = vpop.permute.xlu0 %180 }
 0x477   :  { %v183_v43 = vadd.f32 %v181_v42, %v173_v41 }
 0x479   :  { %799 = vtanh.f32 %v183_v43 }
 0x486   :  { %v800_v44 = vpop.eup %799 }
 0x487   :  { %186 = vrot.lane.b32.xlu1 %v800_v44, %s851_s14 }
 0x4f9   :  { %v187_v45 = vpop.permute.xlu1 %186 }
 0x4fa   :  { %v929_v46 = vmul.f32 %v798_v38, %v187_v45 }
 0x4fc   :  { %v197_v47 = vpack.c.bf16 %v929_v46, %v929_v46 }
 0x4fe   :  { %199 = vrot.lane.b32.xlu0 %v197_v47, %s852_s15 }
 0x570   :  { %v200_v48 = vpop.permute.xlu0 %199 }
 0x571   :  { %735 = vmatmul.mubr.msk.bf16.vlgmr.msra.gmra.mxu0 %vm16_vm0, %v200_v48 }
 0x572   :  { %747 = vmatpush3.bf16.msra.mxu0 %v873_v1  ;;  %750 = vmatprep.mubr.msk.bf16.mxu0 %vm850_vm1, %v849_v0 }
 0x573   :  { %748 = vmatprep.subr.bf16.mxu0 %v849_v0 }
 0x576   :  { %749 = vmatpush3.bf16.msra.mxu0 %v888_v2 }
 0x577   :  { %762 = vmatprep.subr.bf16.mxu0 %v849_v0 }
 0x631   :  { %v238_v50 = vpop.f32.mrf.mxu0 }
 0x632   :  { %v244_v51 = vadd.f32 %v238_v50, %v196_v49 }
 0x633   :  { %v736_v52 = vpop.f32.mrf.mxu0 }
 0x634   :  { %801 = vtanh.f32 %v244_v51  ;;  %v679_v56 = vmul.f32 -1.442695, %v244_v51 }
 0x635   :  { %v241_v53 = vpop.f32.mrf.mxu0 }
 0x636   :  { %803 = vpow2.f32 %v679_v56  ;;  %v428_v53 = vld [vmem:[%s1065_s0 + $0x28] sm:$0xff] }
 0x637   :  { %v737_v54 = vpop.f32.mrf.mxu0 }
 0x641   :  { %v802_v55 = vpop.eup %801 }
 0x642   :  { %254 = vrot.lane.b32.xlu1 %v802_v55, %s851_s14 }
 0x643   :  { %v804_v57 = vpop.eup %803 }
 0x644   :  { %v248_v58 = vadd.f32 1.0, %v804_v57 }
 0x646   :  { %805 = vrcp.f32 %v248_v58 }
 0x653   :  { %v806_v59 = vpop.eup %805 }
 0x654   :  { %v252_v62 = vmul.f32 %v806_v59, %v183_v43 }
 0x6b4   :  { %v255_v60 = vpop.permute.xlu1 %254 }
 0x6b5   :  { %v257_v61 = vmul.f32 %v806_v59, %v255_v60 }
 0x6b7   :  { %259 = vrot.lane.b32.xlu0 %v257_v61, %s852_s15 }
 0x729   :  { %v260_v63 = vpop.permute.xlu0 %259 }
 0x72a   :  { %v262_v3 = vadd.f32 %v260_v63, %v252_v62 }
 0x72c   :  { %807 = vtanh.f32 %v262_v3 }
 0x739   :  { %v808_v4 = vpop.eup %807 }
 0x73a   :  { %265 = vrot.lane.b32.xlu1 %v808_v4, %s851_s14 }
 0x7ac   :  { %v266_v5 = vpop.permute.xlu1 %265 }
 0x7ad   :  { %v947_v6 = vmul.f32 %v806_v59, %v266_v5 }
 0x7af   :  { %v276_v7 = vpack.c.bf16 %v947_v6, %v947_v6 }
 0x7b1   :  { %278 = vrot.lane.b32.xlu0 %v276_v7, %s852_s15 }
 0x823   :  { %v279_v8 = vpop.permute.xlu0 %278 }
 0x824   :  { %743 = vmatmul.mubr.msk.bf16.vlgmr.msra.gmra.mxu1 %vm16_vm0, %v279_v8 }
 0x825   :  { %755 = vmatpush3.bf16.msra.mxu1 %v873_v1  ;;  %758 = vmatprep.mubr.msk.bf16.mxu1 %vm850_vm1, %v849_v0 }
 0x826   :  { %756 = vmatprep.subr.bf16.mxu1 %v849_v0 }
 0x829   :  { %757 = vmatpush3.bf16.msra.mxu1 %v888_v2 }
 0x82a   :  { %770 = vmatprep.subr.bf16.mxu1 %v849_v0 }
 0x8e4   :  { %v317_v10 = vpop.f32.mrf.mxu1 }
 0x8e5   :  { %v323_v11 = vadd.f32 %v317_v10, %v275_v9 }
 0x8e6   :  { %v744_v12 = vpop.f32.mrf.mxu1 }
 0x8e7   :  { %809 = vtanh.f32 %v323_v11  ;;  %v681_v16 = vmul.f32 -1.442695, %v323_v11  ;;  %v506_v11 = vld [vmem:[%s1065_s0 + $0x30] sm:$0xff] }
 0x8e8   :  { %v320_v13 = vpop.f32.mrf.mxu1 }
 0x8e9   :  { %811 = vpow2.f32 %v681_v16 }
 0x8ea   :  { %v745_v14 = vpop.f32.mrf.mxu1 }
 0x8f4   :  { %v810_v15 = vpop.eup %809 }
 0x8f5   :  { %333 = vrot.lane.b32.xlu1 %v810_v15, %s851_s14 }
 0x8f6   :  { %v812_v17 = vpop.eup %811 }
 0x8f7   :  { %v327_v18 = vadd.f32 1.0, %v812_v17 }
 0x8f9   :  { %813 = vrcp.f32 %v327_v18 }
 0x906   :  { %v814_v19 = vpop.eup %813 }
 0x907   :  { %v331_v22 = vmul.f32 %v814_v19, %v262_v3 }
 0x967   :  { %v334_v20 = vpop.permute.xlu1 %333 }
 0x968   :  { %v336_v21 = vmul.f32 %v814_v19, %v334_v20 }
 0x96a   :  { %338 = vrot.lane.b32.xlu0 %v336_v21, %s852_s15 }
 0x9dc   :  { %v339_v23 = vpop.permute.xlu0 %338 }
 0x9dd   :  { %v341_v24 = vadd.f32 %v339_v23, %v331_v22 }
 0x9df   :  { %815 = vtanh.f32 %v341_v24 }
 0x9ec   :  { %v816_v26 = vpop.eup %815 }
 0x9ed   :  { %344 = vrot.lane.b32.xlu1 %v816_v26, %s851_s14 }
 0xa5f   :  { %v345_v27 = vpop.permute.xlu1 %344 }
 0xa60   :  { %v965_v28 = vmul.f32 %v814_v19, %v345_v27 }
 0xa62   :  { %v351_v29 = vpack.c.bf16 %v965_v28, %v965_v28 }
 0xa64   :  { %353 = vrot.lane.b32.xlu0 %v351_v29, %s852_s15 }
 0xad6   :  { %v354_v30 = vpop.permute.xlu0 %353 }
 0xad7   :  { %751 = vmatmul.mubr.msk.bf16.vlgmr.msra.gmra.mxu0 %vm16_vm0, %v354_v30 }
 0xad8   :  { %763 = vmatpush3.bf16.msra.mxu0 %v873_v1  ;;  %766 = vmatprep.mubr.msk.bf16.mxu0 %vm850_vm1, %v849_v0 }
 0xad9   :  { %764 = vmatprep.subr.bf16.mxu0 %v849_v0 }
 0xadc   :  { %765 = vmatpush3.bf16.msra.mxu0 %v888_v2 }
 0xb97   :  { %v392_v32 = vpop.f32.mrf.mxu0 }
 0xb98   :  { %v398_v33 = vadd.f32 %v392_v32, %v350_v31 }
 0xb99   :  { %v752_v34 = vpop.f32.mrf.mxu0 }
 0xb9a   :  { %817 = vtanh.f32 %v398_v33  ;;  %v683_v38 = vmul.f32 -1.442695, %v398_v33  ;;  %v584_v34 = vld [vmem:[%s1065_s0 + $0x38] sm:$0xff]  ;;  %s853_s0 = smov 96  }
 0xb9b   :  { %v395_v35 = vpop.f32.mrf.mxu0 }
 0xb9c   :  { %819 = vpow2.f32 %v683_v38 }
 0xb9d   :  { %v753_v36 = vpop.f32.mrf.mxu0 }
 0xba7   :  { %v818_v37 = vpop.eup %817 }
 0xba8   :  { %408 = vrot.lane.b32.xlu1 %v818_v37, %s851_s14 }
 0xba9   :  { %v820_v39 = vpop.eup %819 }
 0xbaa   :  { %v402_v40 = vadd.f32 1.0, %v820_v39 }
 0xbac   :  { %821 = vrcp.f32 %v402_v40 }
 0xbb9   :  { %v822_v41 = vpop.eup %821 }
 0xbba   :  { %v406_v44 = vmul.f32 %v822_v41, %v341_v24 }
 0xc1a   :  { %v409_v42 = vpop.permute.xlu1 %408 }
 0xc1b   :  { %v411_v43 = vmul.f32 %v822_v41, %v409_v42 }
 0xc1d   :  { %413 = vrot.lane.b32.xlu0 %v411_v43, %s852_s15 }
 0xc8f   :  { %v414_v45 = vpop.permute.xlu0 %413 }
 0xc90   :  { %v416_v47 = vadd.f32 %v414_v45, %v406_v44 }
 0xc92   :  { %823 = vtanh.f32 %v416_v47 }
 0xc9f   :  { %v824_v48 = vpop.eup %823 }
 0xca0   :  { %419 = vrot.lane.b32.xlu1 %v824_v48, %s851_s14 }
 0xd12   :  { %v420_v49 = vpop.permute.xlu1 %419 }
 0xd13   :  { %v982_v50 = vmul.f32 %v822_v41, %v420_v49 }
 0xd15   :  { %v429_v51 = vpack.c.bf16 %v982_v50, %v982_v50 }
 0xd17   :  { %431 = vrot.lane.b32.xlu0 %v429_v51, %s852_s15 }
 0xd89   :  { %v432_v52 = vpop.permute.xlu0 %431 }
 0xd8a   :  { %759 = vmatmul.mubr.msk.bf16.vlgmr.msra.gmra.mxu1 %vm16_vm0, %v432_v52 }
 0xd8b   :  { %771 = vmatpush3.bf16.msra.mxu1 %v873_v1  ;;  %774 = vmatprep.mubr.msk.bf16.mxu1 %vm850_vm1, %v849_v0 }
 0xd8c   :  { %772 = vmatprep.subr.bf16.mxu1 %v849_v0 }
 0xd8f   :  { %773 = vmatpush3.bf16.msra.mxu1 %v888_v2 }
 0xe4a   :  { %v470_v54 = vpop.f32.mrf.mxu1 }
 0xe4b   :  { %v476_v55 = vadd.f32 %v470_v54, %v428_v53 }
 0xe4c   :  { %v760_v56 = vpop.f32.mrf.mxu1 }
 0xe4d   :  { %825 = vtanh.f32 %v476_v55  ;;  %v685_v1 = vmul.f32 -1.442695, %v476_v55 }
 0xe4e   :  { %v473_v57 = vpop.f32.mrf.mxu1 }
 0xe4f   :  { %827 = vpow2.f32 %v685_v1 }
 0xe50   :  { %v761_v58 = vpop.f32.mrf.mxu1 }
 0xe5a   :  { %v826_v59 = vpop.eup %825 }
 0xe5b   :  { %486 = vrot.lane.b32.xlu1 %v826_v59, %s851_s14 }
 0xe5c   :  { %v828_v60 = vpop.eup %827 }
 0xe5d   :  { %v480_v61 = vadd.f32 1.0, %v828_v60 }
 0xe5f   :  { %829 = vrcp.f32 %v480_v61 }
 0xe6c   :  { %v830_v0 = vpop.eup %829 }
 0xe6d   :  { %v484_v63 = vmul.f32 %v830_v0, %v416_v47 }
 0xecd   :  { %v487_v2 = vpop.permute.xlu1 %486 }
 0xece   :  { %v489_v62 = vmul.f32 %v830_v0, %v487_v2 }
 0xed0   :  { %491 = vrot.lane.b32.xlu0 %v489_v62, %s852_s15 }
 0xf42   :  { %v492_v3 = vpop.permute.xlu0 %491 }
 0xf43   :  { %v494_v4 = vadd.f32 %v492_v3, %v484_v63 }
 0xf45   :  { %831 = vtanh.f32 %v494_v4 }
 0xf52   :  { %v832_v5 = vpop.eup %831 }
 0xf53   :  { %497 = vrot.lane.b32.xlu1 %v832_v5, %s851_s14 }
 0xfc5   :  { %v498_v7 = vpop.permute.xlu1 %497 }
 0xfc6   :  { %v999_v8 = vmul.f32 %v830_v0, %v498_v7 }
 0xfc8   :  { %v507_v9 = vpack.c.bf16 %v999_v8, %v999_v8 }
 0xfca   :  { %509 = vrot.lane.b32.xlu0 %v507_v9, %s852_s15 }
0x103c   :  { %v510_v10 = vpop.permute.xlu0 %509 }
0x103d   :  { %767 = vmatmul.mubr.msk.bf16.vlgmr.msra.gmra.mxu0 %vm16_vm0, %v510_v10 }
0x10fd   :  { %v548_v12 = vpop.f32.mrf.mxu0 }
0x10fe   :  { %v554_v13 = vadd.f32 %v548_v12, %v506_v11 }
0x10ff   :  { %v768_v14 = vpop.f32.mrf.mxu0 }
0x1100   :  { %833 = vtanh.f32 %v554_v13  ;;  %v687_v18 = vmul.f32 -1.442695, %v554_v13 }
0x1101   :  { %v551_v15 = vpop.f32.mrf.mxu0 }
0x1102   :  { %835 = vpow2.f32 %v687_v18 }
0x1103   :  { %v769_v16 = vpop.f32.mrf.mxu0 }
0x110d   :  { %v834_v17 = vpop.eup %833 }
0x110e   :  { %564 = vrot.lane.b32.xlu1 %v834_v17, %s851_s14 }
0x110f   :  { %v836_v19 = vpop.eup %835 }
0x1110   :  { %v558_v20 = vadd.f32 1.0, %v836_v19 }
0x1112   :  { %837 = vrcp.f32 %v558_v20 }
0x111f   :  { %v838_v21 = vpop.eup %837 }
0x1120   :  { %v562_v24 = vmul.f32 %v838_v21, %v494_v4 }
0x1180   :  { %v565_v22 = vpop.permute.xlu1 %564 }
0x1181   :  { %v567_v23 = vmul.f32 %v838_v21, %v565_v22 }
0x1183   :  { %569 = vrot.lane.b32.xlu0 %v567_v23, %s852_s15 }
0x11f5   :  { %v570_v26 = vpop.permute.xlu0 %569 }
0x11f6   :  { %v572_v27 = vadd.f32 %v570_v26, %v562_v24 }
0x11f8   :  { %839 = vtanh.f32 %v572_v27 }
0x1205   :  { %v840_v29 = vpop.eup %839 }
0x1206   :  { %575 = vrot.lane.b32.xlu1 %v840_v29, %s851_s14 }
0x1278   :  { %v576_v30 = vpop.permute.xlu1 %575 }
0x1279   :  { %v578_v31 = vmul.f32 %v838_v21, %v576_v30 }
0x127b   :  { %v585_v32 = vpack.c.bf16 %v578_v31, %v578_v31 }
0x127d   :  { %587 = vrot.lane.b32.xlu0 %v585_v32, %s852_s15 }
0x12ef   :  { %v588_v33 = vpop.permute.xlu0 %587 }
0x12f0   :  { %775 = vmatmul.mubr.msk.bf16.vlgmr.msra.gmra.mxu1 %vm16_vm0, %v588_v33 }
0x13b0   :  { %v626_v35 = vpop.f32.mrf.mxu1 }
0x13b1   :  { %v632_v36 = vadd.f32 %v626_v35, %v584_v34 }
0x13b2   :  { %v776_v37 = vpop.f32.mrf.mxu1 }
0x13b3   :  { %841 = vtanh.f32 %v632_v36  ;;  %v689_v41 = vmul.f32 -1.442695, %v632_v36 }
0x13b4   :  { %v629_v38 = vpop.f32.mrf.mxu1 }
0x13b5   :  { %843 = vpow2.f32 %v689_v41 }
0x13b6   :  { %v777_v39 = vpop.f32.mrf.mxu1 }
0x13c0   :  { %v842_v40 = vpop.eup %841 }
0x13c1   :  { %642 = vrot.lane.b32.xlu1 %v842_v40, %s851_s14 }
0x13c2   :  { %v844_v42 = vpop.eup %843 }
0x13c3   :  { %v636_v43 = vadd.f32 1.0, %v844_v42 }
0x13c5   :  { %845 = vrcp.f32 %v636_v43 }
0x13d2   :  { %v846_v44 = vpop.eup %845 }
0x13d3   :  { %v640_v48 = vmul.f32 %v846_v44, %v572_v27 }
0x1433   :  { %v643_v45 = vpop.permute.xlu1 %642 }
0x1434   :  { %v645_v47 = vmul.f32 %v846_v44, %v643_v45 }
0x1436   :  { %647 = vrot.lane.b32.xlu0 %v645_v47, %s852_s15 }
0x143a   :  { %113 = vrot.lane.b32.xlu0 %v911_v25, %s852_s15 }
0x143e   :  { %191 = vrot.lane.b32.xlu0 %v929_v46, %s851_s14 }
0x1442   :  { %270 = vrot.lane.b32.xlu0 %v947_v6, %s853_s0 }
0x14a8   :  { %v648_v49 = vpop.permute.xlu0 %647 }
0x14a9   :  { %v650_v51 = vadd.f32 %v648_v49, %v640_v48 }
0x14ab   :  { %847 = vtanh.f32 %v650_v51 }
0x14ac   :  { %v114_v52 = vpop.permute.xlu0 %113 }
0x14ad   :  { %116 = vst.msk [vmem:[%s1066_s2] sm:$0xff] %vm16_vm0, %v114_v52 }
0x14b0   :  { %v192_v53 = vpop.permute.xlu0 %191 }
0x14b1   :  { %195 = vst.msk [vmem:[%s1066_s2] sm:$0xff] %vm194_vm2, %v192_v53 }
0x14b4   :  { %v271_v25 = vpop.permute.xlu0 %270 }
0x14b5   :  { %274 = vst.msk [vmem:[%s1066_s2] sm:$0xff] %vm273_vm3, %v271_v25 }
0x14b6   :  { %349 = vst.msk [vmem:[%s1066_s2] sm:$0xff] %vm348_vm4, %v965_v28 }
0x14b8   :  { %v848_v46 = vpop.eup %847 }
0x14b9   :  { %653 = vrot.lane.b32.xlu1 %v848_v46, %s851_s14 }
0x14bd   :  { %424 = vrot.lane.b32.xlu1 %v982_v50, %s852_s15 }
0x14c1   :  { %502 = vrot.lane.b32.xlu1 %v999_v8, %s851_s14 }
0x14c5   :  { %580 = vrot.lane.b32.xlu1 %v578_v31, %s853_s0 }
0x14c9   :  { %664 = vrot.lane.b32.xlu1 %v650_v51, %s853_s0 }
0x152b   :  { %v654_v6 = vpop.permute.xlu1 %653 }
0x152c   :  { %v656_v54 = vmul.f32 %v846_v44, %v654_v6 }
0x152e   :  { %659 = vrot.lane.b32.xlu0 %v656_v54, %s852_s15 }
0x152f   :  { %v425_v55 = vpop.permute.xlu1 %424 }
0x1530   :  { %427 = vst.msk [vmem:[%s1066_s2 + $0x8] sm:$0xff] %vm16_vm0, %v425_v55 }
0x1533   :  { %v503_v28 = vpop.permute.xlu1 %502 }
0x1534   :  { %505 = vst.msk [vmem:[%s1066_s2 + $0x8] sm:$0xff] %vm194_vm2, %v503_v28 }
0x1537   :  { %v581_v50 = vpop.permute.xlu1 %580 }
0x1538   :  { %583 = vst.msk [vmem:[%s1066_s2 + $0x8] sm:$0xff] %vm273_vm3, %v581_v50 }
0x1539   :  { %657 = vst.msk [vmem:[%s1066_s2 + $0x8] sm:$0xff] %vm348_vm4, %v656_v54 }
0x153b   :  { %v665_v56 = vpop.permute.xlu1 %664 }
0x153c   :  { %667 = vst.msk [vmem:[#allocation3] sm:$0xff] %vm16_vm0, %v665_v56 }
0x15a0   :  { %v660_v57 = vpop.permute.xlu0 %659 }
0x15a1   :  { %662 = vst.msk [vmem:[#allocation2] sm:$0xff] %vm16_vm0, %v660_v57 }

</bundles_post_ra>
